<compile_context>
chip_gen: v6e
topology: v6e:2x2x1
jax: 0.10.0
libtpu: 0.0.40
codegen_flags: <defaults>
</compile_context>

<pallas_src>
import math
import jax
import jax.numpy as jnp
from jax.experimental import pallas as pl
from jax.experimental.pallas import tpu as pltpu

# ---- model dims (match nn.Module defaults) ----------------------------------
LIDAR_INPUT_SIZE = 360
LIDAR_PADDED = 384              # 3 x 128 lanes (zero-padded K dim for wl1)
LIDAR_EMBED_DIM = 128
POSE_DIM = 3
TIME_EMBED_DIM = 32
HIDDEN_DIM = 256
OUT_W = 8                       # lane-padded output width (cols 3..7 exact zero)
AUX_POSE_OFF = TIME_EMBED_DIM   # aux layout: [ te(0..31) | pose(32..34) ]
AUX_W = TIME_EMBED_DIM + POSE_DIM
NUM_HIDDEN_LAYERS = 2           # fixed at 2 in this kernel


def _round_up(x, m):
    return ((x + m - 1) // m) * m


# ---- fused kernel ------------------------------------------------------------
def diffusion_kernel(
    aux_ref, lidar_ref,                          # activations: (TB,35) f32, (TB,360) f32
    wl1_ref, bl1_ref, wl2_ref, bl2_ref,          # lidar encoder
    wm1p_ref, wm1ct_ref, bm1_ref,                # denoise layer 1 (pose rows / [c|te] rows)
    wm2_ref, bm2_ref,                            # denoise layer 2
    wo_ref, bo_ref,                              # output layer (8-lane padded)
    out_ref,
):
    f32 = jnp.float32
    bf16 = jnp.bfloat16

    # --- LiDAR encoder: cast + zero-pad K 360->384 in-kernel, bf16 MXU / f32 acc
    lid = lidar_ref[...].astype(bf16)                              # (TB, 360)
    lid = jnp.concatenate(
        [lid, jnp.zeros((lid.shape[0], LIDAR_PADDED - LIDAR_INPUT_SIZE), bf16)],
        axis=-1)                                                   # (TB, 384)
    h = jnp.dot(lid, wl1_ref[...], preferred_element_type=f32) + bl1_ref[...]
    h = jnp.maximum(h.astype(bf16), 0)                             # fold downcast into ReLU
    c = jnp.dot(h, wl2_ref[...], preferred_element_type=f32) + bl2_ref[...]
    c = jnp.maximum(c.astype(bf16), 0)                             # (TB, 128) bf16

    # --- time embedding arrives precomputed in the aux input (lanes 0..31) ---
    te = aux_ref[:, :TIME_EMBED_DIM].astype(bf16)                  # (TB, 32)

    # --- denoise layer 1: one K=160 MXU matmul over concat([c, te]);
    #     the K=3 pose contribution stays on the VPU as broadcast FMAs. ---
    ct = jnp.concatenate([c, te], axis=-1)                         # (TB, 160) bf16
    x1 = jnp.dot(ct, wm1ct_ref[...], preferred_element_type=f32) + bm1_ref[...]
    for k in range(POSE_DIM):
        x1 = x1 + (aux_ref[:, AUX_POSE_OFF + k:AUX_POSE_OFF + k + 1]
                   * wm1p_ref[k:k + 1, :])
    x1 = jnp.maximum(x1.astype(bf16), 0)                           # (TB, 256) bf16

    # --- denoise layer 2 ---
    x2 = jnp.dot(x1, wm2_ref[...], preferred_element_type=f32) + bm2_ref[...]
    x2 = jnp.maximum(x2.astype(bf16), 0)

    # --- output layer: 8-lane padded (columns 3..7 of wo/bo are exact zeros) ---
    out_ref[...] = jnp.dot(x2, wo_ref[...], preferred_element_type=f32) + bo_ref[...]


# ---- parameter construction (deterministic, PyTorch-Linear-like init) -------
def init_params(key):
    def linear(key, fan_in, fan_out):
        kw, kb = jax.random.split(key)
        bound = 1.0 / math.sqrt(fan_in)
        w = jax.random.uniform(kw, (fan_in, fan_out), jnp.float32, -bound, bound)
        b = jax.random.uniform(kb, (1, fan_out), jnp.float32, -bound, bound)
        return w, b

    keys = jax.random.split(key, 7)
    p = {}
    p["wl1"], p["bl1"] = linear(keys[0], LIDAR_INPUT_SIZE, LIDAR_EMBED_DIM)
    p["wl2"], p["bl2"] = linear(keys[1], LIDAR_EMBED_DIM, LIDAR_EMBED_DIM)
    p["wt1"], p["bt1"] = linear(keys[2], 1, TIME_EMBED_DIM)
    p["wt2"], p["bt2"] = linear(keys[3], TIME_EMBED_DIM, TIME_EMBED_DIM)
    p["wm1"], p["bm1"] = linear(keys[4], POSE_DIM + LIDAR_EMBED_DIM + TIME_EMBED_DIM,
                                HIDDEN_DIM)
    p["wm2"], p["bm2"] = linear(keys[5], HIDDEN_DIM, HIDDEN_DIM)
    p["wo"], p["bo"] = linear(keys[6], HIDDEN_DIM, POSE_DIM)
    return p


def prepare_params(params):
    """One-time conversion of raw f32 params -> kernel-layout params.

    Splits wm1 along the concat axis, zero-pads the lidar K dim and the output
    width, and casts MXU operands to bf16.  Time-embed weights stay f32 (they
    are used by the tiny XLA-side te computation, not the kernel)."""
    bf16 = jnp.bfloat16
    wm1 = params["wm1"]
    return {
        # lidar encoder (K padded 360 -> 384 with exact-zero rows)
        "wl1": jnp.pad(params["wl1"],
                       ((0, LIDAR_PADDED - LIDAR_INPUT_SIZE), (0, 0))).astype(bf16),
        "bl1": params["bl1"],
        "wl2": params["wl2"].astype(bf16),
        "bl2": params["bl2"],
        # time embed (computed outside the kernel)
        "wt1": params["wt1"], "bt1": params["bt1"],
        "wt2": params["wt2"], "bt2": params["bt2"],
        # denoise layer 1: pose rows (VPU, f32, padded to 8 sublanes) + [c|te] rows (MXU)
        "wm1p": jnp.pad(wm1[:POSE_DIM], ((0, 8 - POSE_DIM), (0, 0))),    # (8, 256) f32
        "wm1ct": wm1[POSE_DIM:].astype(bf16),                            # (160, 256)
        "bm1": params["bm1"],
        # denoise layer 2
        "wm2": params["wm2"].astype(bf16),
        "bm2": params["bm2"],
        # output layer, padded to 8 columns (padding is exact zeros)
        "wo": jnp.pad(params["wo"], ((0, 0), (0, OUT_W - POSE_DIM))).astype(bf16),
        "bo": jnp.pad(params["bo"], ((0, 0), (0, OUT_W - POSE_DIM))),
    }


# ---- wrapper -----------------------------------------------------------------
def diffusion_regressor(pose_t, lidar_input, t, kparams, *, block_b=None):
    B = pose_t.shape[0]

    # --- time embedding: tiny (B,32), done with plain XLA ops (64 B/row) ---
    t2 = t.reshape(B, 1).astype(jnp.float32)
    te = jnp.maximum(t2 @ kparams["wt1"] + kparams["bt1"], 0.0)
    te = jnp.maximum(te @ kparams["wt2"] + kparams["bt2"], 0.0)

    # --- merge te + pose into one small side input: [te(32) | pose(3)] ---
    aux = jnp.concatenate([te, pose_t.astype(jnp.float32)], axis=-1)  # (B, 35)
    lidar = lidar_input.astype(jnp.float32)                          # no pad/cast pre-pass

    # --- tile selection: aim for >= 8 grid steps (pipelining + v7x core
    #     sharding), minimum 16 rows, capped at 512 rows per tile. ---
    if block_b is None:
        block_b = min(512, _round_up(max(pl.cdiv(B, 8), 16), 16))
    TB = max(16, _round_up(block_b, 16))
    B_pad = _round_up(B, TB)
    grid = B_pad // TB

    if B_pad != B:   # ragged last tile: pad only when needed (usually a no-op)
        aux = jnp.pad(aux, ((0, B_pad - B), (0, 0)))
        lidar = jnp.pad(lidar, ((0, B_pad - B), (0, 0)))

    kp = kparams
    weights = (kp["wl1"], kp["bl1"], kp["wl2"], kp["bl2"],
               kp["wm1p"], kp["wm1ct"], kp["bm1"],
               kp["wm2"], kp["bm2"], kp["wo"], kp["bo"])

    def act_spec(feat):
        return pl.BlockSpec((TB, feat), lambda i: (i, 0))

    def w_spec(arr):
        # Constant block index -> weight stays resident in VMEM across the grid.
        return pl.BlockSpec(arr.shape, lambda i: (0, 0))

    in_specs = ([act_spec(AUX_W), act_spec(LIDAR_INPUT_SIZE)]
                + [w_spec(w) for w in weights])
    out_spec = act_spec(OUT_W)

    # --- VMEM estimate: only set an explicit limit when a user-chosen tile
    #     would exceed v5e's 16 MiB default scoped-VMEM limit. ---
    w_bytes = sum(int(w.size) * w.dtype.itemsize for w in weights)
    vmem_est = (2 * TB * (AUX_W + LIDAR_INPUT_SIZE + OUT_W) * 4   # double-buffered blocks
                + 2 * w_bytes                                      # resident weights
                + 8 * TB * HIDDEN_DIM * 4)                         # intermediates headroom
    vmem_limit = (min(2 * vmem_est, 96 * 1024 * 1024)
                  if vmem_est > 12 * 1024 * 1024 else None)

    flops = 2 * B_pad * (LIDAR_PADDED * LIDAR_EMBED_DIM
                         + LIDAR_EMBED_DIM * LIDAR_EMBED_DIM
                         + (LIDAR_EMBED_DIM + TIME_EMBED_DIM) * HIDDEN_DIM
                         + HIDDEN_DIM * HIDDEN_DIM
                         + HIDDEN_DIM * OUT_W)
    bytes_accessed = (int(aux.size) * 4 + int(lidar.size) * 4
                      + w_bytes + B_pad * OUT_W * 4)

    out = pl.pallas_call(
        diffusion_kernel,
        out_shape=jax.ShapeDtypeStruct((B_pad, OUT_W), jnp.float32),
        grid=(grid,),
        in_specs=in_specs,
        out_specs=out_spec,
        compiler_params=pltpu.CompilerParams(
            dimension_semantics=("parallel",),
            vmem_limit_bytes=vmem_limit),
        cost_estimate=pl.CostEstimate(flops=flops, transcendentals=0,
                                      bytes_accessed=bytes_accessed),
    )(aux, lidar, *weights)

    return out[:B, :POSE_DIM]


# ---- pure-JAX reference (for verification) -----------------------------------
def diffusion_regressor_ref(pose_t, lidar_input, t, params):
    relu = lambda x: jnp.maximum(x, 0.0)
    B = pose_t.shape[0]
    h = relu(lidar_input @ params["wl1"] + params["bl1"])
    c = relu(h @ params["wl2"] + params["bl2"])
    t2 = t.reshape(B, 1).astype(jnp.float32)
    te = relu(t2 @ params["wt1"] + params["bt1"])
    te = relu(te @ params["wt2"] + params["bt2"])
    x = jnp.concatenate([pose_t, c, te], axis=-1)
    x = relu(x @ params["wm1"] + params["bm1"])
    x = relu(x @ params["wm2"] + params["bm2"])
    return x @ params["wo"] + params["bo"]


if __name__ == "__main__":
    key = jax.random.PRNGKey(0)
    kparam_key, k1, k2, k3 = jax.random.split(key, 4)

    params = init_params(kparam_key)
    kparams = prepare_params(params)          # one-time layout conversion

    B = 32
    pose_t = jax.random.normal(k1, (B, POSE_DIM), jnp.float32)
    lidar_input = jax.random.normal(k2, (B, LIDAR_INPUT_SIZE), jnp.float32)
    t = jax.random.randint(k3, (B,), 0, 1000).astype(jnp.float32)

    # default tile selection -> TB=16, grid=(2,): multi-step even at this size.
    out = diffusion_regressor(pose_t, lidar_input, t, kparams)
    out = jax.block_until_ready(out)

    ref = diffusion_regressor_ref(pose_t, lidar_input, t, params)
    assert out.shape == (B, POSE_DIM)
    # bf16 MXU operands with f32 accumulation: check error relative to output scale.
    scale = jnp.maximum(jnp.max(jnp.abs(ref)), 1.0)
    max_err = jnp.max(jnp.abs(out - ref))
    assert float(max_err / scale) < 5e-2, f"mismatch vs reference: max_err={max_err}"

    print("KERNEL_OK")
</pallas_src>

<mosaic_0001>
module attributes {stable_mosaic.version = 11 : i64} {
  func.func @diffusion_kernel(%arg0: i32, %arg1: memref<16x35xf32, #tpu.memory_space<vmem>>, %arg2: memref<16x360xf32, #tpu.memory_space<vmem>>, %arg3: memref<384x128xbf16, #tpu.memory_space<vmem>>, %arg4: memref<1x128xf32, #tpu.memory_space<vmem>>, %arg5: memref<128x128xbf16, #tpu.memory_space<vmem>>, %arg6: memref<1x128xf32, #tpu.memory_space<vmem>>, %arg7: memref<8x256xf32, #tpu.memory_space<vmem>>, %arg8: memref<160x256xbf16, #tpu.memory_space<vmem>>, %arg9: memref<1x256xf32, #tpu.memory_space<vmem>>, %arg10: memref<256x256xbf16, #tpu.memory_space<vmem>>, %arg11: memref<1x256xf32, #tpu.memory_space<vmem>>, %arg12: memref<256x8xbf16, #tpu.memory_space<vmem>>, %arg13: memref<1x8xf32, #tpu.memory_space<vmem>>, %arg14: memref<16x8xf32, #tpu.memory_space<vmem>>) attributes {dimension_semantics = [#tpu.dimension_semantics<parallel>], iteration_bounds = array<i64: 2>, scalar_prefetch = 0 : i64, scratch_operands = 0 : i64, tpu.core_type = #tpu.core_type<tc>, window_params = [{transform_indices = @transform_0, window_bounds = array<i64: 16, 35>}, {transform_indices = @transform_1, window_bounds = array<i64: 16, 360>}, {pipeline_mode = #tpu.pipeline_mode<synchronous>, transform_indices = @transform_2, window_bounds = array<i64: 384, 128>}, {pipeline_mode = #tpu.pipeline_mode<synchronous>, transform_indices = @transform_3, window_bounds = array<i64: 1, 128>}, {pipeline_mode = #tpu.pipeline_mode<synchronous>, transform_indices = @transform_4, window_bounds = array<i64: 128, 128>}, {pipeline_mode = #tpu.pipeline_mode<synchronous>, transform_indices = @transform_5, window_bounds = array<i64: 1, 128>}, {pipeline_mode = #tpu.pipeline_mode<synchronous>, transform_indices = @transform_6, window_bounds = array<i64: 8, 256>}, {pipeline_mode = #tpu.pipeline_mode<synchronous>, transform_indices = @transform_7, window_bounds = array<i64: 160, 256>}, {pipeline_mode = #tpu.pipeline_mode<synchronous>, transform_indices = @transform_8, window_bounds = array<i64: 1, 256>}, {pipeline_mode = #tpu.pipeline_mode<synchronous>, transform_indices = @transform_9, window_bounds = array<i64: 256, 256>}, {pipeline_mode = #tpu.pipeline_mode<synchronous>, transform_indices = @transform_10, window_bounds = array<i64: 1, 256>}, {pipeline_mode = #tpu.pipeline_mode<synchronous>, transform_indices = @transform_11, window_bounds = array<i64: 256, 8>}, {pipeline_mode = #tpu.pipeline_mode<synchronous>, transform_indices = @transform_12, window_bounds = array<i64: 1, 8>}, {transform_indices = @transform_13, window_bounds = array<i64: 16, 8>}]} {
    %c0 = arith.constant 0 : index
    %c0_0 = arith.constant 0 : index
    %0 = vector.load %arg2[%c0, %c0_0] : memref<16x360xf32, #tpu.memory_space<vmem>>, vector<16x360xf32>
    %1 = arith.truncf %0 : vector<16x360xf32> to vector<16x360xbf16>
    %cst = arith.constant 0.000000e+00 : bf16
    %2 = vector.broadcast %cst : bf16 to vector<16x24xbf16>
    %3 = tpu.concatenate %1, %2 in 1 : vector<16x360xbf16>, vector<16x24xbf16> -> vector<16x384xbf16>
    %c0_1 = arith.constant 0 : index
    %c0_2 = arith.constant 0 : index
    %4 = vector.load %arg3[%c0_1, %c0_2] : memref<384x128xbf16, #tpu.memory_space<vmem>>, vector<384x128xbf16>
    %cst_3 = arith.constant dense<0.000000e+00> : vector<16x128xf32>
    %5 = tpu.matmul %3, %4, %cst_3 {dimension_numbers = #tpu.dot_dimension_numbers<[1], [0], [0], [1], [0, 0, 1, 1], [], []>} : vector<16x384xbf16>, vector<384x128xbf16>, vector<16x128xf32> -> vector<16x128xf32>
    %c0_4 = arith.constant 0 : index
    %c0_5 = arith.constant 0 : index
    %6 = vector.load %arg4[%c0_4, %c0_5] : memref<1x128xf32, #tpu.memory_space<vmem>>, vector<1x128xf32>
    %7 = vector.broadcast %6 : vector<1x128xf32> to vector<16x128xf32>
    %8 = arith.addf %5, %7 : vector<16x128xf32>
    %9 = arith.truncf %8 : vector<16x128xf32> to vector<16x128xbf16>
    %cst_6 = arith.constant 0.000000e+00 : bf16
    %10 = vector.broadcast %cst_6 : bf16 to vector<16x128xbf16>
    %11 = arith.maximumf %9, %10 : vector<16x128xbf16>
    %c0_7 = arith.constant 0 : index
    %c0_8 = arith.constant 0 : index
    %12 = vector.load %arg5[%c0_7, %c0_8] : memref<128x128xbf16, #tpu.memory_space<vmem>>, vector<128x128xbf16>
    %cst_9 = arith.constant dense<0.000000e+00> : vector<16x128xf32>
    %13 = tpu.matmul %11, %12, %cst_9 {dimension_numbers = #tpu.dot_dimension_numbers<[1], [0], [0], [1], [0, 0, 1, 1], [], []>} : vector<16x128xbf16>, vector<128x128xbf16>, vector<16x128xf32> -> vector<16x128xf32>
    %c0_10 = arith.constant 0 : index
    %c0_11 = arith.constant 0 : index
    %14 = vector.load %arg6[%c0_10, %c0_11] : memref<1x128xf32, #tpu.memory_space<vmem>>, vector<1x128xf32>
    %15 = vector.broadcast %14 : vector<1x128xf32> to vector<16x128xf32>
    %16 = arith.addf %13, %15 : vector<16x128xf32>
    %17 = arith.truncf %16 : vector<16x128xf32> to vector<16x128xbf16>
    %cst_12 = arith.constant 0.000000e+00 : bf16
    %18 = vector.broadcast %cst_12 : bf16 to vector<16x128xbf16>
    %19 = arith.maximumf %17, %18 : vector<16x128xbf16>
    %c0_13 = arith.constant 0 : index
    %c0_14 = arith.constant 0 : index
    %20 = vector.load %arg1[%c0_13, %c0_14] : memref<16x35xf32, #tpu.memory_space<vmem>>, vector<16x32xf32>
    %21 = arith.truncf %20 : vector<16x32xf32> to vector<16x32xbf16>
    %22 = tpu.concatenate %19, %21 in 1 : vector<16x128xbf16>, vector<16x32xbf16> -> vector<16x160xbf16>
    %c0_15 = arith.constant 0 : index
    %c0_16 = arith.constant 0 : index
    %23 = vector.load %arg8[%c0_15, %c0_16] : memref<160x256xbf16, #tpu.memory_space<vmem>>, vector<160x256xbf16>
    %cst_17 = arith.constant dense<0.000000e+00> : vector<16x256xf32>
    %24 = tpu.matmul %22, %23, %cst_17 {dimension_numbers = #tpu.dot_dimension_numbers<[1], [0], [0], [1], [0, 0, 1, 1], [], []>} : vector<16x160xbf16>, vector<160x256xbf16>, vector<16x256xf32> -> vector<16x256xf32>
    %c0_18 = arith.constant 0 : index
    %c0_19 = arith.constant 0 : index
    %25 = vector.load %arg9[%c0_18, %c0_19] : memref<1x256xf32, #tpu.memory_space<vmem>>, vector<1x256xf32>
    %26 = vector.broadcast %25 : vector<1x256xf32> to vector<16x256xf32>
    %27 = arith.addf %24, %26 : vector<16x256xf32>
    %c0_20 = arith.constant 0 : index
    %c32 = arith.constant 32 : index
    %28 = vector.load %arg1[%c0_20, %c32] : memref<16x35xf32, #tpu.memory_space<vmem>>, vector<16x1xf32>
    %c0_21 = arith.constant 0 : index
    %c0_22 = arith.constant 0 : index
    %29 = vector.load %arg7[%c0_21, %c0_22] : memref<8x256xf32, #tpu.memory_space<vmem>>, vector<1x256xf32>
    %30 = vector.broadcast %28 : vector<16x1xf32> to vector<16x256xf32>
    %31 = vector.broadcast %29 : vector<1x256xf32> to vector<16x256xf32>
    %32 = arith.mulf %30, %31 : vector<16x256xf32>
    %33 = arith.addf %27, %32 : vector<16x256xf32>
    %c0_23 = arith.constant 0 : index
    %c33 = arith.constant 33 : index
    %34 = vector.load %arg1[%c0_23, %c33] : memref<16x35xf32, #tpu.memory_space<vmem>>, vector<16x1xf32>
    %c1 = arith.constant 1 : index
    %c0_24 = arith.constant 0 : index
    %35 = vector.load %arg7[%c1, %c0_24] : memref<8x256xf32, #tpu.memory_space<vmem>>, vector<1x256xf32>
    %36 = vector.broadcast %34 : vector<16x1xf32> to vector<16x256xf32>
    %37 = vector.broadcast %35 : vector<1x256xf32> to vector<16x256xf32>
    %38 = arith.mulf %36, %37 : vector<16x256xf32>
    %39 = arith.addf %33, %38 : vector<16x256xf32>
    %c0_25 = arith.constant 0 : index
    %c34 = arith.constant 34 : index
    %40 = vector.load %arg1[%c0_25, %c34] : memref<16x35xf32, #tpu.memory_space<vmem>>, vector<16x1xf32>
    %c2 = arith.constant 2 : index
    %c0_26 = arith.constant 0 : index
    %41 = vector.load %arg7[%c2, %c0_26] : memref<8x256xf32, #tpu.memory_space<vmem>>, vector<1x256xf32>
    %42 = vector.broadcast %40 : vector<16x1xf32> to vector<16x256xf32>
    %43 = vector.broadcast %41 : vector<1x256xf32> to vector<16x256xf32>
    %44 = arith.mulf %42, %43 : vector<16x256xf32>
    %45 = arith.addf %39, %44 : vector<16x256xf32>
    %46 = arith.truncf %45 : vector<16x256xf32> to vector<16x256xbf16>
    %cst_27 = arith.constant 0.000000e+00 : bf16
    %47 = vector.broadcast %cst_27 : bf16 to vector<16x256xbf16>
    %48 = arith.maximumf %46, %47 : vector<16x256xbf16>
    %c0_28 = arith.constant 0 : index
    %c0_29 = arith.constant 0 : index
    %49 = vector.load %arg10[%c0_28, %c0_29] : memref<256x256xbf16, #tpu.memory_space<vmem>>, vector<256x256xbf16>
    %cst_30 = arith.constant dense<0.000000e+00> : vector<16x256xf32>
    %50 = tpu.matmul %48, %49, %cst_30 {dimension_numbers = #tpu.dot_dimension_numbers<[1], [0], [0], [1], [0, 0, 1, 1], [], []>} : vector<16x256xbf16>, vector<256x256xbf16>, vector<16x256xf32> -> vector<16x256xf32>
    %c0_31 = arith.constant 0 : index
    %c0_32 = arith.constant 0 : index
    %51 = vector.load %arg11[%c0_31, %c0_32] : memref<1x256xf32, #tpu.memory_space<vmem>>, vector<1x256xf32>
    %52 = vector.broadcast %51 : vector<1x256xf32> to vector<16x256xf32>
    %53 = arith.addf %50, %52 : vector<16x256xf32>
    %54 = arith.truncf %53 : vector<16x256xf32> to vector<16x256xbf16>
    %cst_33 = arith.constant 0.000000e+00 : bf16
    %55 = vector.broadcast %cst_33 : bf16 to vector<16x256xbf16>
    %56 = arith.maximumf %54, %55 : vector<16x256xbf16>
    %c0_34 = arith.constant 0 : index
    %c0_35 = arith.constant 0 : index
    %57 = vector.load %arg12[%c0_34, %c0_35] : memref<256x8xbf16, #tpu.memory_space<vmem>>, vector<256x8xbf16>
    %cst_36 = arith.constant dense<0.000000e+00> : vector<16x8xf32>
    %58 = tpu.matmul %56, %57, %cst_36 {dimension_numbers = #tpu.dot_dimension_numbers<[1], [0], [0], [1], [0, 0, 1, 1], [], []>} : vector<16x256xbf16>, vector<256x8xbf16>, vector<16x8xf32> -> vector<16x8xf32>
    %c0_37 = arith.constant 0 : index
    %c0_38 = arith.constant 0 : index
    %59 = vector.load %arg13[%c0_37, %c0_38] : memref<1x8xf32, #tpu.memory_space<vmem>>, vector<1x8xf32>
    %60 = vector.broadcast %59 : vector<1x8xf32> to vector<16x8xf32>
    %61 = arith.addf %58, %60 : vector<16x8xf32>
    %c0_39 = arith.constant 0 : index
    %c0_40 = arith.constant 0 : index
    %62 = vector.load %arg14[%c0_39, %c0_40] : memref<16x8xf32, #tpu.memory_space<vmem>>, vector<16x8xf32>
    tpu.vector_store %arg14[%c0_39, %c0_40], %61 {strides = array<i32>} : memref<16x8xf32, #tpu.memory_space<vmem>>, vector<16x8xf32>,
    return
  }
  func.func @transform_0(%arg0: i32) -> (i32, i32) {
    %c0_i32 = arith.constant 0 : i32
    %c0_i32_0 = arith.constant 0 : i32
    return %arg0, %c0_i32 : i32, i32
  }
  func.func @transform_1(%arg0: i32) -> (i32, i32) {
    %c0_i32 = arith.constant 0 : i32
    %c0_i32_0 = arith.constant 0 : i32
    return %arg0, %c0_i32 : i32, i32
  }
  func.func @transform_2(%arg0: i32) -> (i32, i32) {
    %c0_i32 = arith.constant 0 : i32
    %c0_i32_0 = arith.constant 0 : i32
    %c0_i32_1 = arith.constant 0 : i32
    return %c0_i32, %c0_i32_0 : i32, i32
  }
  func.func @transform_3(%arg0: i32) -> (i32, i32) {
    %c0_i32 = arith.constant 0 : i32
    %c0_i32_0 = arith.constant 0 : i32
    %c0_i32_1 = arith.constant 0 : i32
    return %c0_i32, %c0_i32_0 : i32, i32
  }
  func.func @transform_4(%arg0: i32) -> (i32, i32) {
    %c0_i32 = arith.constant 0 : i32
    %c0_i32_0 = arith.constant 0 : i32
    %c0_i32_1 = arith.constant 0 : i32
    return %c0_i32, %c0_i32_0 : i32, i32
  }
  func.func @transform_5(%arg0: i32) -> (i32, i32) {
    %c0_i32 = arith.constant 0 : i32
    %c0_i32_0 = arith.constant 0 : i32
    %c0_i32_1 = arith.constant 0 : i32
    return %c0_i32, %c0_i32_0 : i32, i32
  }
  func.func @transform_6(%arg0: i32) -> (i32, i32) {
    %c0_i32 = arith.constant 0 : i32
    %c0_i32_0 = arith.constant 0 : i32
    %c0_i32_1 = arith.constant 0 : i32
    return %c0_i32, %c0_i32_0 : i32, i32
  }
  func.func @transform_7(%arg0: i32) -> (i32, i32) {
    %c0_i32 = arith.constant 0 : i32
    %c0_i32_0 = arith.constant 0 : i32
    %c0_i32_1 = arith.constant 0 : i32
    return %c0_i32, %c0_i32_0 : i32, i32
  }
  func.func @transform_8(%arg0: i32) -> (i32, i32) {
    %c0_i32 = arith.constant 0 : i32
    %c0_i32_0 = arith.constant 0 : i32
    %c0_i32_1 = arith.constant 0 : i32
    return %c0_i32, %c0_i32_0 : i32, i32
  }
  func.func @transform_9(%arg0: i32) -> (i32, i32) {
    %c0_i32 = arith.constant 0 : i32
    %c0_i32_0 = arith.constant 0 : i32
    %c0_i32_1 = arith.constant 0 : i32
    return %c0_i32, %c0_i32_0 : i32, i32
  }
  func.func @transform_10(%arg0: i32) -> (i32, i32) {
    %c0_i32 = arith.constant 0 : i32
    %c0_i32_0 = arith.constant 0 : i32
    %c0_i32_1 = arith.constant 0 : i32
    return %c0_i32, %c0_i32_0 : i32, i32
  }
  func.func @transform_11(%arg0: i32) -> (i32, i32) {
    %c0_i32 = arith.constant 0 : i32
    %c0_i32_0 = arith.constant 0 : i32
    %c0_i32_1 = arith.constant 0 : i32
    return %c0_i32, %c0_i32_0 : i32, i32
  }
  func.func @transform_12(%arg0: i32) -> (i32, i32) {
    %c0_i32 = arith.constant 0 : i32
    %c0_i32_0 = arith.constant 0 : i32
    %c0_i32_1 = arith.constant 0 : i32
    return %c0_i32, %c0_i32_0 : i32, i32
  }
  func.func @transform_13(%arg0: i32) -> (i32, i32) {
    %c0_i32 = arith.constant 0 : i32
    %c0_i32_0 = arith.constant 0 : i32
    return %arg0, %c0_i32 : i32, i32
  }
}

</mosaic_0001>

<bundles_post_ra>
// kernel: tpu_custom_call.1
= control target key start
LH: loop header
LB: loop body
LE: loop exit
PB: predicated region body
PF: predicated region fallthrough
CT: control target
= control target key end

     0   :  { %18 = vsyncpa [#allocation3], 0  ;;  %s2813_s0 = inlined_call_operand.vmem [shape: f32[32,35], index: 0, kind: input, shape index: {}]   ;;  %s2814_s1 = inlined_call_operand.vmem [shape: f32[32,360], index: 1, kind: input, shape index: {}]   ;;  %s2815_s2 = inlined_call_operand.hbm [shape: bf16[384,128], index: 2, kind: input, shape index: {}]   ;;  %s2816_s3 = inlined_call_operand.hbm [shape: f32[1,128], index: 3, kind: input, shape index: {}]   ;;  %s2817_s4 = inlined_call_operand.hbm [shape: bf16[128,128], index: 4, kind: input, shape index: {}]   ;;  %s2818_s5 = inlined_call_operand.hbm [shape: f32[1,128], index: 5, kind: input, shape index: {}]   ;;  %s2819_s6 = inlined_call_operand.vmem [shape: f32[8,256], index: 6, kind: input, shape index: {}]   ;;  %s2820_s7 = inlined_call_operand.hbm [shape: bf16[160,256], index: 7, kind: input, shape index: {}]   ;;  %s2821_s8 = inlined_call_operand.hbm [shape: f32[1,256], index: 8, kind: input, shape index: {}]   ;;  %s2822_s9 = inlined_call_operand.hbm [shape: bf16[256,256], index: 9, kind: input, shape index: {}]   ;;  %s2823_s10 = inlined_call_operand.vmem [shape: f32[1,256], index: 10, kind: input, shape index: {}]   ;;  %s2824_s11 = inlined_call_operand.vmem [shape: bf16[256,8], index: 11, kind: input, shape index: {}]   ;;  %s2825_s12 = inlined_call_operand.vmem [shape: f32[1,8], index: 12, kind: input, shape index: {}]   ;;  %s2826_s13 = inlined_call_operand.vmem [shape: f32[32,8], index: 13, kind: output, shape index: {}]  }
   0x1   :  { %19 = vsyncpa [#allocation5], 0 }
   0x2   :  { %20 = vsyncpa [#allocation8], 0 }
   0x3   :  { %21 = vsyncpa [#allocation11], 0  ;;  %s2567_s25 = smov 0  }
   0x4 LB: > { %s2480_s26 = smov [#allocation4]   ;;  %s1818_s28 = sadd.s32 4294967295, %s2478_s25   ;;  %s2478_s25 = sphi %s2567_s25, %s27_s25  }
   0x5   : > { %s367_s27 = sshll.u32 %s2480_s26, 4  ;;  %p1820_p0 = scmp.ge.s32.totalorder %s2478_s25, 1  ;;  %s368_s27 = int_to_ptr.vmem [resolvable:$true] %s367_s27 }
   0x6   : > { %p341_p1 = scmp.lt.s32.totalorder %s2478_s25, 3  ;;  %p2577_p2 = scmp.eq.s32.totalorder %s1818_s28, 0 }
   0x7   : > { %s2481_s14 = smov [#allocation7]   ;;  %s2482_s16 = smov [#allocation10]  }
   0x8   : > { %s2830_s29 = scalar_select %p2577_p2, 1, 0 }
   0x9   : > { %p2581_p3 = pnand %p1820_p0, %p341_p1  ;;  %s391_s15 = sshll.u32 %s2481_s14, 4  ;;  %s2587_s15 = int_to_ptr.vmem [resolvable:$true] %s391_s15 }
   0xa   : > { %s418_s17 = sshll.u32 %s2482_s16, 4  ;;  %s2483_s19 = smov [#allocation2]   ;;  %s2595_s17 = int_to_ptr.vmem [resolvable:$true] %s418_s17 }
   0xb   : > { %s2831_s30 = scalar_select %p2581_p3, 1, 0 }
   0xc   : > { %p2083_p4 = pneg %p2581_p3  ;;  %s353_s20 = sshll.u32 %s2483_s19, 4  ;;  %s2597_s20 = int_to_ptr.vmem [resolvable:$true] %s353_s20 }
   0xd   : > { %s2285_s22 = scalar_lea.vmem %s368_s27, 16  ;;  %s2292_s23 = scalar_lea.vmem %s368_s27, 32 }
   0xe   : > { %p2591_p5 = pnand %p2577_p2, %p2083_p4  ;;  %p2286_p7 = scmp.ne.s32.totalorder %s368_s27, %s2285_s22 }
   0xf   : > { %p2293_p10 = scmp.lt.s32.totalorder %s368_s27, %s368_s27  ;;  %p2294_p11 = scmp.lt.s32.totalorder %s2292_s23, %s2285_s22 }
  0x10   : > { %p2601_p6 = pneg %p2591_p5 }
  0x11   : > { %p2295_p12 = por %p2294_p11, %p2293_p10 }
  0x12   : > { %p2288_p8 = pnand %p2286_p7, %p2601_p6 }
  0x14   : > { %p2289_p9 = pneg %p2288_p8 }
  0x16   : > { %p2296_p13 = pnand %p2295_p12, %p2289_p9 }
  0x18   : > { %2299 = shalt.err (!%p2296_p13)
}
  0x19   : > { %2089 = dma.hbm_to_vmem [thread:$0]  (!%p2591_p5), %s2816_s3, 16, %s368_s27, [#allocation5]  }
  0x1a   : > { %s2311_s14 = scalar_lea.vmem %s2587_s15, 16  ;;  %s2318_s16 = scalar_lea.vmem %s2587_s15, 32 }
  0x1b   : > { %p2312_p0 = scmp.ne.s32.totalorder %s2587_s15, %s2311_s14  ;;  %p2319_p7 = scmp.lt.s32.totalorder %s2587_s15, %s2587_s15 }
  0x1c   : > { %p2320_p8 = scmp.lt.s32.totalorder %s2318_s16, %s2311_s14 }
  0x1d   : > { %p2314_p1 = pnand %p2312_p0, %p2601_p6 }
  0x1e   : > { %p2321_p9 = por %p2320_p8, %p2319_p7 }
  0x1f   : > { %p2315_p4 = pneg %p2314_p1 }
  0x21   : > { %p2322_p10 = pnand %p2321_p9, %p2315_p4 }
  0x23   : > { %2325 = shalt.err (!%p2322_p10)
}
  0x24   : > { %2095 = dma.hbm_to_vmem [thread:$0]  (!%p2591_p5), %s2818_s5, 16, %s2587_s15, [#allocation8]  }
  0x25   : > { %s2337_s27 = scalar_lea.vmem %s2595_s17, 32  ;;  %p2345_p0 = scmp.lt.s32.totalorder %s2595_s17, %s2595_s17 }
  0x26   : > { %p2338_p11 = scmp.ne.s32.totalorder %s2595_s17, %s2337_s27  ;;  %p2346_p1 = scmp.lt.s32.totalorder %s2337_s27, %s2337_s27 }
  0x28   : > { %p2340_p12 = pnand %p2338_p11, %p2601_p6  ;;  %p2347_p4 = por %p2346_p1, %p2345_p0 }
  0x2a   : > { %p2341_p13 = pneg %p2340_p12 }
  0x2c   : > { %p2348_p7 = pnand %p2347_p4, %p2341_p13 }
  0x2e   : > { %2351 = shalt.err (!%p2348_p7)
}
  0x2f   : > { %2101 = dma.hbm_to_vmem [thread:$0]  (!%p2591_p5), %s2821_s8, 32, %s2595_s17, [#allocation11]  }
  0x30   : > { %s2363_s15 = scalar_lea.vmem %s2597_s20, 3072  ;;  %p2371_p11 = scmp.lt.s32.totalorder %s2597_s20, %s2597_s20 }
  0x31   : > { %p2364_p8 = scmp.ne.s32.totalorder %s2597_s20, %s2363_s15  ;;  %p2372_p12 = scmp.lt.s32.totalorder %s2363_s15, %s2363_s15 }
  0x33   : > { %p2366_p9 = pnand %p2364_p8, %p2601_p6  ;;  %p2373_p13 = por %p2372_p12, %p2371_p11 }
  0x35   : > { %p2367_p10 = pneg %p2366_p9 }
  0x37   : > { %p2374_p0 = pnand %p2373_p13, %p2367_p10 }
  0x39   : > { %2377 = shalt.err (!%p2374_p0)
}
  0x3a   : > { %s2484_s26 = smov 64   ;;  %s2485_s14 = smov 4  }
  0x3b   : > { %2086 = dma.hbm_to_vmem [thread:$0]  (!%p2591_p5), %s2815_s2, 3072, %s2597_s20, [#allocation3], %s2484_s26, %s2484_s26, %s2485_s14  }
  0x3c   : > { %s2486_s17 = smov [#allocation6]   ;;  %s2487_s27 = smov [#allocation9]  }
  0x3d   : > { %s377_s22 = sshll.u32 %s2486_s17, 4  ;;  %s404_s23 = sshll.u32 %s2487_s27, 4  ;;  %s378_s22 = int_to_ptr.vmem [resolvable:$true] %s377_s22  ;;  %s405_s23 = int_to_ptr.vmem [resolvable:$true] %s404_s23 }
  0x3e   : > { %s2389_s24 = scalar_lea.vmem %s378_s22, 1024  ;;  %p2397_p8 = scmp.lt.s32.totalorder %s378_s22, %s378_s22 }
  0x3f   : > { %p2390_p1 = scmp.ne.s32.totalorder %s378_s22, %s2389_s24  ;;  %p2398_p9 = scmp.lt.s32.totalorder %s2389_s24, %s2389_s24 }
  0x41   : > { %p2392_p4 = pnand %p2390_p1, %p2601_p6  ;;  %p2399_p10 = por %p2398_p9, %p2397_p8 }
  0x43   : > { %p2393_p7 = pneg %p2392_p4 }
  0x45   : > { %p2400_p11 = pnand %p2399_p10, %p2393_p7 }
  0x47   : > { %2403 = shalt.err (!%p2400_p11)
}
  0x48   : > { %2092 = dma.hbm_to_vmem [thread:$0]  (!%p2591_p5), %s2817_s4, 1024, %s378_s22, [#allocation5], %s2484_s26, %s2484_s26, %s2485_s14  }
  0x49   : > { %s2415_s20 = scalar_lea.vmem %s405_s23, 2560  ;;  %p2423_p1 = scmp.lt.s32.totalorder %s405_s23, %s405_s23 }
  0x4a   : > { %p2416_p12 = scmp.ne.s32.totalorder %s405_s23, %s2415_s20  ;;  %p2424_p4 = scmp.lt.s32.totalorder %s2415_s20, %s2415_s20 }
  0x4c   : > { %p2418_p13 = pnand %p2416_p12, %p2601_p6  ;;  %p2425_p2 = por %p2424_p4, %p2423_p1 }
  0x4e   : > { %p2419_p0 = pneg %p2418_p13 }
  0x50   : > { %p2426_p3 = pnand %p2425_p2, %p2419_p0 }
  0x52   : > { %2429 = shalt.err (!%p2426_p3)
}
  0x53   : > { %s2488_s19 = smov 128   ;;  %s2489_s17 = smov 8  }
  0x54   : > { %2098 = dma.hbm_to_vmem [thread:$0]  (!%p2591_p5), %s2820_s7, 2560, %s405_s23, [#allocation8], %s2488_s19, %s2488_s19, %s2489_s17  }
  0x55   : > { %s2490_s26 = smov [#allocation12]  }
  0x56   : > { %s428_s14 = sshll.u32 %s2490_s26, 4  ;;  %s429_s14 = int_to_ptr.vmem [resolvable:$true] %s428_s14 }
  0x57   : > { %s2441_s22 = scalar_lea.vmem %s429_s14, 4096  ;;  %p2449_p10 = scmp.lt.s32.totalorder %s429_s14, %s429_s14 }
  0x58   : > { %p2442_p7 = scmp.ne.s32.totalorder %s429_s14, %s2441_s22  ;;  %p2450_p2 = scmp.lt.s32.totalorder %s2441_s22, %s2441_s22 }
  0x5a   : > { %p2444_p8 = pnand %p2442_p7, %p2601_p6  ;;  %p2451_p3 = por %p2450_p2, %p2449_p10 }
  0x5c   : > { %p2445_p9 = pneg %p2444_p8 }
  0x5e   : > { %p2452_p11 = pnand %p2451_p3, %p2445_p9 }
  0x60   : > { %2455 = shalt.err (!%p2452_p11)
}
  0x61   : > { %2104 = dma.hbm_to_vmem [thread:$0]  (!%p2591_p5), %s2822_s9, 4096, %s429_s14, [#allocation11], %s2488_s19, %s2488_s19, %s2489_s17  }
  0x62   : > { %p2834_p12 = scmp.ne.s32.totalorder %s2831_s30, 0 }
  0x63   : > { %p2835_p13 = scmp.ne.s32.totalorder (!%p2834_p12), %s2830_s29, 0 }
  0x64   : > { %472 = sbr.rel (%p2834_p12) target bundleno = 1180 (0x49c), region = 72 }
  0x69   : > { %2461 = dma.done.wait (%p2835_p13), [#allocation3], 3072  }
  0x6a   : > { %2463 = vsyncadd (%p2835_p13), [#allocation3], 4294964224 }
  0x6b   : > { %2465 = dma.done.wait (%p2835_p13), [#allocation5], 1040  }
  0x6c   : > { %2467 = vsyncadd (%p2835_p13), [#allocation5], 4294966256 }
  0x6d   : > { %2469 = dma.done.wait (%p2835_p13), [#allocation8], 2576  }
  0x6e   : > { %2471 = vsyncadd (%p2835_p13), [#allocation8], 4294964720 }
  0x6f   : > { %2473 = dma.done.wait (%p2835_p13), [#allocation11], 4128  }
  0x70   : > { %2475 = vsyncadd (%p2835_p13), [#allocation11], 4294963168  ;;  %v2491_v0 = vmov 0.0   ;;  %vm2492_vm0 = vmmov 0   ;;  %v2148_v1 = vld [vmem:[#allocation2 + $0x78] sm:$0xff]   ;;  %v2151_v4 = vld [vmem:[#allocation2 + $0x70] sm:$0xff]  }
  0x71   : > { %2014 = vmatprep.subr.bf16.mxu1 %v2491_v0  ;;  %2030 = vmatprep.mubr.msk.bf16.mxu1 %vm2492_vm0, %v2491_v0  ;;  %v2149_v2 = vld [vmem:[#allocation2 + $0x38] sm:$0xff]   ;;  %v2152_v5 = vld [vmem:[#allocation2 + $0x30] sm:$0xff]   ;;  %v2154_v7 = vld [vmem:[#allocation2 + $0x68] sm:$0xff]   ;;  %s1837_s29 = sshll.u32 %s1818_s28, 1  ;;  %vm575_vm1 = vcmask 850944   ;;  %vm1112_vm2 = vcmask 261120  }
  0x72   : > { %1952 = vmatprep.subr.bf16.mxu0 %v2148_v1  ;;  %v2150_v3 = vld [vmem:[#allocation2 + $0xb8] sm:$0xff]   ;;  %v2153_v6 = vld [vmem:[#allocation2 + $0xb0] sm:$0xff]   ;;  %v2155_v8 = vld [vmem:[#allocation2 + $0x28] sm:$0xff]   ;;  %p547_p5 = scmp.lt.s32.totalorder %s1837_s29, 3  ;;  %vm1678_vm3 = vcmask 64512  }
  0x73   : > { %1953 = vmatpush3.bf16.msra.mxu0 %v2149_v2  ;;  %2015 = vmatpush3.bf16.msra.mxu1 %v2150_v3  ;;  %v2156_v9 = vld [vmem:[#allocation2 + $0xa8] sm:$0xff]   ;;  %v2157_v10 = vld [vmem:[#allocation2 + $0x60] sm:$0xff]   ;;  %v2160_v13 = vld [vmem:[#allocation2 + $0x58] sm:$0xff]  }
  0x74   : > { %1954 = vmatprep.subr.bf16.mxu0 %v2151_v4  ;;  %2016 = vmatprep.subr.bf16.mxu1 %v2491_v0  ;;  %v2158_v11 = vld [vmem:[#allocation2 + $0x20] sm:$0xff]   ;;  %s2837_s29 = smov (!%p547_p5, %s1837_s29), 3  ;;  %v2161_v14 = vld [vmem:[#allocation2 + $0x18] sm:$0xff]   ;;  %v2163_v16 = vld [vmem:[#allocation2 + $0x50] sm:$0xff]  }
  0x75   : > { %v2159_v12 = vld [vmem:[#allocation2 + $0xa0] sm:$0xff]   ;;  %v2162_v15 = vld [vmem:[#allocation2 + $0x98] sm:$0xff]   ;;  %s2054_s28 = smul.u32 24, %s2837_s29  ;;  %v2164_v17 = vld [vmem:[#allocation2 + $0x10] sm:$0xff]   ;;  %s1838_s23 = sshll.u32 %s2837_s29, 3 }
  0x76   : > { %v2165_v18 = vld [vmem:[#allocation2 + $0x90] sm:$0xff]   ;;  %v2166_v19 = vld [vmem:[#allocation2 + $0x48] sm:$0xff]   ;;  %v2169_v22 = vld [vmem:[#allocation2 + $0x40] sm:$0xff]   ;;  %s550_s17 = scalar_lea.vmem %s2813_s0, %s1838_s23  ;;  %s563_s26 = scalar_lea.vmem %s2826_s13, %s1838_s23 }
  0x77   : > { %1955 = vmatpush3.bf16.msra.mxu0 %v2152_v5  ;;  %2017 = vmatpush3.bf16.msra.mxu1 %v2153_v6  ;;  %s557_s21 = scalar_lea.vmem %s2814_s1, %s2054_s28  ;;  %v2167_v20 = vld [vmem:[#allocation2 + $0x8] sm:$0xff]   ;;  %v2170_v25 = vld [vmem:[#allocation2] sm:$0xff]   ;;  %v2173_v35 = vld [vmem:[#allocation6 + $0x30] sm:$0xff]  }
  0x78   : > { %1956 = vmatprep.subr.bf16.mxu0 %v2154_v7  ;;  %2018 = vmatprep.subr.bf16.mxu1 %v2491_v0  ;;  %v2168_v21 = vld [vmem:[#allocation2 + $0x88] sm:$0xff]   ;;  %v570_v24 = vld [vmem:[%s557_s21 + $0x20] sm:$0xff]  ;;  %v569_v29 = vld [vmem:[%s557_s21 + $0x18] sm:$0xff] }
  0x79   : > { %v567_v23 = vld [vmem:[%s557_s21 + $0x8] sm:$0xff]  ;;  %v566_v27 = vld [vmem:[%s557_s21] sm:$0xff]  ;;  %v568_v30 = vld [vmem:[%s557_s21 + $0x10] sm:$0xff] }
  0x7a   : > { %v573_v26 = vpack.c.bf16 %v570_v24, %v567_v23  ;;  %v2171_v28 = vld [vmem:[#allocation2 + $0x80] sm:$0xff]   ;;  %v571_v31 = vld [vmem:[%s557_s21 + $0x28] sm:$0xff]  ;;  %v572_v33 = vpack.c.bf16 %v569_v29, %v566_v27  ;;  %v2177_v39 = vld [vmem:[#allocation6 + $0x10] sm:$0xff]  }
  0x7b   : > { %1957 = vmatpush3.bf16.msra.mxu0 %v2155_v8  ;;  %2019 = vmatpush3.bf16.msra.mxu1 %v2156_v9  ;;  %v2172_v32 = vld [vmem:[#allocation6 + $0x38] sm:$0xff]   ;;  %v574_v34 = vpack.c.bf16 %v571_v31, %v568_v30  ;;  %v2174_v36 = vld [vmem:[#allocation6 + $0x28] sm:$0xff]   ;;  %v2175_v37 = vld [vmem:[#allocation6 + $0x20] sm:$0xff]  }
  0x7c   : > { %1958 = vmatprep.subr.bf16.mxu0 %v2157_v10  ;;  %2020 = vmatprep.subr.bf16.mxu1 %v2491_v0  ;;  %v2176_v38 = vld [vmem:[#allocation6 + $0x18] sm:$0xff]   ;;  %v2178_v40 = vld [vmem:[#allocation6 + $0x8] sm:$0xff]   ;;  %v2179_v41 = vld [vmem:[#allocation6] sm:$0xff]   ;;  %v2493_v10 = vmov 0  }
  0x7d   : > { %811 = vmatprep.mubr.bf16.mxu0 %v573_v26  ;;  %v2180_v42 = vld [vmem:[#allocation9 + $0x70] ss:$8 sps:$4 sm:$0xff]   ;;  %v2182_v43 = vld [vmem:[#allocation9 + $0x74] ss:$8 sps:$4 sm:$0xff]   ;;  %v2185_v44 = vld [vmem:[#allocation9 + $0x64] ss:$8 sps:$4 sm:$0xff]  }
  0x7e   : > { %v2183_v45 = vld [vmem:[#allocation9 + $0x60] ss:$8 sps:$4 sm:$0xff]   ;;  %v2188_v46 = vld [vmem:[#allocation9 + $0x54] ss:$8 sps:$4 sm:$0xff]   ;;  %v2186_v47 = vld [vmem:[#allocation9 + $0x50] ss:$8 sps:$4 sm:$0xff]  }
  0x7f   : > { %1959 = vmatpush3.bf16.msra.mxu0 %v2158_v11  ;;  %2021 = vmatpush3.bf16.msra.mxu1 %v2159_v12  ;;  %v2191_v48 = vld [vmem:[#allocation9 + $0x44] ss:$8 sps:$4 sm:$0xff]   ;;  %v2189_v49 = vld [vmem:[#allocation9 + $0x40] ss:$8 sps:$4 sm:$0xff]   ;;  %v2194_v50 = vld [vmem:[#allocation9 + $0x34] ss:$8 sps:$4 sm:$0xff]  }
  0x80   : > { %1960 = vmatprep.subr.bf16.mxu0 %v2160_v13  ;;  %2022 = vmatprep.subr.bf16.mxu1 %v2491_v0  ;;  %v2192_v51 = vld [vmem:[#allocation9 + $0x30] ss:$8 sps:$4 sm:$0xff]   ;;  %v2197_v52 = vld [vmem:[#allocation9 + $0x24] ss:$8 sps:$4 sm:$0xff]   ;;  %v2195_v53 = vld [vmem:[#allocation9 + $0x20] ss:$8 sps:$4 sm:$0xff]  }
  0x81   : > { %v2200_v54 = vld [vmem:[#allocation9 + $0x14] ss:$8 sps:$4 sm:$0xff]   ;;  %v2198_v55 = vld [vmem:[#allocation9 + $0x10] ss:$8 sps:$4 sm:$0xff]   ;;  %v2203_v56 = vld [vmem:[#allocation9 + $0x4] ss:$8 sps:$4 sm:$0xff]  }
  0x82   : > { %v2201_v57 = vld [vmem:[#allocation9] ss:$8 sps:$4 sm:$0xff]   ;;  %v1843_v63 = vld [vmem:[#allocation4] ss:$0 sm:$0xff]  ;;  %v2204_v12 = vld [vmem:[#allocation9 + $0x90] ss:$8 sps:$4 sm:$0xff]  }
  0x83   : > { %1961 = vmatpush3.bf16.msra.mxu0 %v2161_v14  ;;  %2023 = vmatpush3.bf16.msra.mxu1 %v2162_v15  ;;  %v2206_v13 = vld [vmem:[#allocation9 + $0x94] ss:$8 sps:$4 sm:$0xff]   ;;  %v2209_v14 = vld [vmem:[#allocation9 + $0x84] ss:$8 sps:$4 sm:$0xff]   ;;  %v2207_v15 = vld [vmem:[#allocation9 + $0x80] ss:$8 sps:$4 sm:$0xff]  }
  0x84   : > { %1962 = vmatprep.subr.bf16.mxu0 %v2163_v16  ;;  %2024 = vmatprep.subr.bf16.mxu1 %v2491_v0  ;;  %v977_v16 = vld [vmem:[%s550_s17] sm:$0xff]  ;;  %v2215_v23 = vld [vmem:[#allocation12 + $0x64] ss:$8 sps:$4 sm:$0xff]  }
  0x85   : > { %v2213_v24 = vld [vmem:[#allocation12 + $0x60] ss:$8 sps:$4 sm:$0xff]   ;;  %v2216_v26 = vld [vmem:[#allocation12 + $0x50] ss:$8 sps:$4 sm:$0xff]   ;;  %v2221_v27 = vld [vmem:[#allocation12 + $0x44] ss:$8 sps:$4 sm:$0xff]  }
  0x86   : > { %v2219_v29 = vld [vmem:[#allocation12 + $0x40] ss:$8 sps:$4 sm:$0xff]   ;;  %v2224_v30 = vld [vmem:[#allocation12 + $0x34] ss:$8 sps:$4 sm:$0xff]   ;;  %v2222_v31 = vld [vmem:[#allocation12 + $0x30] ss:$8 sps:$4 sm:$0xff]  }
  0x87   : > { %1963 = vmatpush3.bf16.msra.mxu0 %v2164_v17  ;;  %2025 = vmatpush3.bf16.msra.mxu1 %v2165_v18  ;;  %v978_v17 = vld [vmem:[%s550_s17 + $0x8] sm:$0xff] }
  0x88   : > { %1964 = vmatprep.subr.bf16.mxu0 %v2166_v19  ;;  %2026 = vmatprep.subr.bf16.mxu1 %v2491_v0  ;;  %v979_v18 = vpack.c.bf16 %v978_v17, %v977_v16  ;;  %v2210_v19 = vld [vmem:[#allocation12 + $0x70] ss:$8 sps:$4 sm:$0xff]  }
  0x8b   : > { %1965 = vmatpush3.bf16.msra.mxu0 %v2167_v20  ;;  %2027 = vmatpush3.bf16.msra.mxu1 %v2168_v21  ;;  %v2494_v20 = vmov 32   ;;  %v2495_v21 = vmov 33  }
  0x8c   : > { %1966 = vmatprep.subr.bf16.mxu0 %v2169_v22  ;;  %2028 = vmatprep.subr.bf16.mxu1 %v2491_v0  ;;  %v2212_v22 = vld [vmem:[#allocation12 + $0x74] ss:$8 sps:$4 sm:$0xff]  }
  0x8d   : > { %2144 = vset.pattern.permute.xlu0 %v2494_v20  ;;  %2145 = vset.pattern.permute.xlu1 %v2495_v21  ;;  %v1899_v20 = vld [vmem:[%s2819_s6 + $0x1] ss:$8 sm:$0x3] }
  0x8e   : > { %1162 = vperm.xlu0 %2144, %v977_v16   ;;  %1192 = vperm.xlu1 %2145, %v977_v16  }
  0x8f   : > { %1967 = vmatpush3.bf16.msra.mxu0 %v2170_v25  ;;  %2029 = vmatpush3.bf16.msra.mxu1 %v2171_v28  ;;  %v2218_v25 = vld [vmem:[#allocation12 + $0x54] ss:$8 sps:$4 sm:$0xff]   ;;  %v2496_v28 = vmov 34  }
  0x90   : > { %2034 = vmatprep.subr.bf16.mxu0 %v2491_v0  ;;  %1116 = vmatprep.subr.bf16.mxu1 %v2182_v43  ;;  %v2240_v43 = vld [vmem:[#allocation12 + $0xd0] ss:$8 sps:$4 sm:$0xff]  }
  0x92   : > { %812 = vmatmul.mubr.bf16.vlgmr.msra.gmra.mxu0 %v572_v33  ;;  %2031 = vmatmul.mubr.msk.bf16.vlgmr.msra.gmra.mxu1 %vm575_vm1, %v574_v34  ;;  %v2225_v33 = vld [vmem:[#allocation12 + $0x20] ss:$8 sps:$4 sm:$0xff]   ;;  %v2230_v34 = vld [vmem:[#allocation12 + $0x14] ss:$8 sps:$4 sm:$0xff]  }
  0x93   : > { %2035 = vmatpush3.bf16.msra.mxu0 %v2172_v32  ;;  %2050 = vmatprep.mubr.msk.bf16.mxu0 %vm2492_vm0, %v2491_v0  ;;  %v2227_v32 = vld [vmem:[#allocation12 + $0x24] ss:$8 sps:$4 sm:$0xff]  }
  0x94   : > { %2036 = vmatprep.subr.bf16.mxu0 %v2491_v0  ;;  %1117 = vmatpush1.bf16.msra.mxu1 %v2180_v42  ;;  %v2242_v42 = vld [vmem:[#allocation12 + $0xd4] ss:$8 sps:$4 sm:$0xff]  }
  0x95   : > { %1118 = vmatprep.subr.bf16.mxu1 %v2185_v44  ;;  %1898 = vmatprep.mubr.msk.bf16.mxu1 %vm1112_vm2, %v979_v18 }
  0x96   : > { %1167 = vperm.xlu0 %2144, %v978_v17   ;;  %1196 = vperm.xlu1 %2145, %v978_v17  }
  0x97   : > { %2037 = vmatpush3.bf16.msra.mxu0 %v2173_v35  ;;  %v2228_v35 = vld [vmem:[#allocation12 + $0x10] ss:$8 sps:$4 sm:$0xff]  }
  0x98   : > { %2038 = vmatprep.subr.bf16.mxu0 %v2491_v0  ;;  %1119 = vmatpush1.bf16.msra.mxu1 %v2183_v45  ;;  %v1869_v45 = vld [vmem:[#allocation7] ss:$0 sm:$0xff] }
  0x99   : > { %1120 = vmatprep.subr.bf16.mxu1 %v2188_v46 }
  0x9a   : > { %2146 = vset.pattern.permute.xlu0 %v2496_v28  ;;  %2147 = vset.pattern.permute.xlu1 %v2496_v28 }
  0x9b   : > { %2039 = vmatpush3.bf16.msra.mxu0 %v2174_v36  ;;  %1221 = vperm.xlu0 %2146, %v977_v16   ;;  %v2233_v36 = vld [vmem:[#allocation12 + $0x4] ss:$8 sps:$4 sm:$0xff]  }
  0x9c   : > { %2040 = vmatprep.subr.bf16.mxu0 %v2491_v0  ;;  %1121 = vmatpush1.bf16.msra.mxu1 %v2186_v47 }
  0x9d   : > { %1122 = vmatprep.subr.bf16.mxu1 %v2191_v48  ;;  %1225 = vperm.xlu1 %2147, %v978_v17   ;;  %v1000_v17 = vld [vmem:[#allocation10] sm:$0x3] }
  0x9f   : > { %2041 = vmatpush3.bf16.msra.mxu0 %v2175_v37  ;;  %v2231_v37 = vld [vmem:[#allocation12] ss:$8 sps:$4 sm:$0xff]  }
  0xa0   : > { %2042 = vmatprep.subr.bf16.mxu0 %v2491_v0  ;;  %1123 = vmatpush1.bf16.msra.mxu1 %v2189_v49 }
  0xa1   : > { %1124 = vmatprep.subr.bf16.mxu1 %v2194_v50 }
  0xa3   : > { %2043 = vmatpush3.bf16.msra.mxu0 %v2176_v38  ;;  %v2236_v38 = vld [vmem:[#allocation12 + $0xf4] ss:$8 sps:$4 sm:$0xff]  }
  0xa4   : > { %2044 = vmatprep.subr.bf16.mxu0 %v2491_v0  ;;  %1125 = vmatpush1.bf16.msra.mxu1 %v2192_v51 }
  0xa5   : > { %1126 = vmatprep.subr.bf16.mxu1 %v2197_v52 }
  0xa7   : > { %2045 = vmatpush3.bf16.msra.mxu0 %v2177_v39  ;;  %v2234_v39 = vld [vmem:[#allocation12 + $0xf0] ss:$8 sps:$4 sm:$0xff]  }
  0xa8   : > { %2046 = vmatprep.subr.bf16.mxu0 %v2491_v0  ;;  %1127 = vmatpush1.bf16.msra.mxu1 %v2195_v53  ;;  %v2245_v53 = vld [vmem:[#allocation12 + $0xc4] ss:$8 sps:$4 sm:$0xff]  }
  0xa9   : > { %1128 = vmatprep.subr.bf16.mxu1 %v2200_v54  ;;  %v2243_v54 = vld [vmem:[#allocation12 + $0xc0] ss:$8 sps:$4 sm:$0xff]  }
  0xab   : > { %2047 = vmatpush3.bf16.msra.mxu0 %v2178_v40  ;;  %v2239_v40 = vld [vmem:[#allocation12 + $0xe4] ss:$8 sps:$4 sm:$0xff]  }
  0xac   : > { %2048 = vmatprep.subr.bf16.mxu0 %v2491_v0  ;;  %1129 = vmatpush1.bf16.msra.mxu1 %v2198_v55  ;;  %v2248_v55 = vld [vmem:[#allocation12 + $0xb4] ss:$8 sps:$4 sm:$0xff]  }
  0xad   : > { %1130 = vmatprep.subr.bf16.mxu1 %v2203_v56  ;;  %v2246_v56 = vld [vmem:[#allocation12 + $0xb0] ss:$8 sps:$4 sm:$0xff]  }
  0xaf   : > { %2049 = vmatpush3.bf16.msra.mxu0 %v2179_v41  ;;  %v2237_v41 = vld [vmem:[#allocation12 + $0xe0] ss:$8 sps:$4 sm:$0xff]  }
  0xb0   : > { %1131 = vmatpush1.bf16.msra.mxu1 %v2201_v57  ;;  %1455 = vmatprep.subr.bf16.mxu0 %v2212_v22  ;;  %v2251_v57 = vld [vmem:[#allocation12 + $0xa4] ss:$8 sps:$4 sm:$0xff]  }
  0xb1   : > { %1144 = vmatprep.subr.bf16.mxu1 %v2206_v13 }
  0xb4   : > { %1145 = vmatpush2.bf16.msra.mxu1 %v2204_v12 }
  0xb5   : > { %1146 = vmatprep.subr.bf16.mxu1 %v2209_v14  ;;  %v1159_v14 = vld [vmem:[%s2819_s6] ss:$8 sm:$0x3] }
  0xb8   : > { %1147 = vmatpush2.bf16.msra.mxu1 %v2207_v15 }
 0x109   : > { %v1163_v15 = vpop.permute.xlu0 %1162  ;;  %v1193_v16 = vpop.permute.xlu1 %1192 }
 0x111   : > { %v1168_v22 = vpop.permute.xlu0 %1167 }
 0x152   : > { %v1968_v58 = vpop.f32.mrf.mxu0  ;;  %v854_v59 = vpop.f32.mrf.mxu1 }
 0x154   : > { %v1969_v60 = vpop.f32.mrf.mxu0  ;;  %v2032_v62 = vpop.f32.mrf.mxu1 }
 0x155   : > { %v1970_v61 = vadd.f32 %v1969_v60, %v1968_v58  ;;  %v2249_v58 = vld [vmem:[#allocation12 + $0xa0] ss:$8 sps:$4 sm:$0xff]   ;;  %v2252_v60 = vld [vmem:[#allocation12 + $0x90] ss:$8 sps:$4 sm:$0xff]   ;;  %v2257_v62 = vld [vmem:[#allocation12 + $0x84] ss:$8 sps:$4 sm:$0xff]  }
 0x156   : > { %v1971_v0 = vpop.f32.mrf.mxu0  ;;  %v857_v1 = vpop.f32.mrf.mxu1 }
 0x157   : > { %v814_v3 = vadd.f32 %v1970_v61, %v1843_v63  ;;  %v2255_v61 = vld [vmem:[#allocation12 + $0x80] ss:$8 sps:$4 sm:$0xff]  }
 0x158   : > { %v1972_v2 = vpop.f32.mrf.mxu0  ;;  %v2033_v5 = vpop.f32.mrf.mxu1 }
 0x159   : > { %v1973_v4 = vadd.f32 %v1972_v2, %v1971_v0  ;;  %v855_v7 = vadd.f32 %v854_v59, %v814_v3  ;;  %v2254_v59 = vld [vmem:[#allocation12 + $0x94] ss:$8 sps:$4 sm:$0xff]   ;;  %v2261_v2 = vld [vmem:[%s2824_s11 + $0x30] sm:$0xff]   ;;  %v2262_v3 = vld [vmem:[%s2824_s11 + $0x68] sm:$0xff]  }
 0x15a   : > { %v2259_v0 = vld [vmem:[%s2824_s11 + $0x38] sm:$0xff]   ;;  %v2264_v5 = vld [vmem:[%s2824_s11 + $0x60] sm:$0xff]  }
 0x15b   : > { %v817_v6 = vadd.f32 %v1973_v4, %v1843_v63  ;;  %v2258_v63 = vld [vmem:[%s2824_s11 + $0x78] sm:$0xff]   ;;  %v2263_v4 = vld [vmem:[%s2824_s11 + $0x28] sm:$0xff]  }
 0x15c   : > { %1992 = vmatprep.subr.bf16.mxu1 %v2258_v63 }
 0x15d   : > { %v858_v8 = vadd.f32 %v857_v1, %v817_v6  ;;  %v2260_v1 = vld [vmem:[%s2824_s11 + $0x70] sm:$0xff]   ;;  %v2265_v6 = vld [vmem:[%s2824_s11 + $0x20] sm:$0xff]  }
 0x15f   : > { %v861_v9 = vpack.c.bf16 %v858_v8, %v855_v7  ;;  %v2266_v7 = vld [vmem:[%s2824_s11 + $0x58] sm:$0xff]  }
 0x160   : > { %v2267_v8 = vld [vmem:[%s2824_s11 + $0x18] sm:$0xff]  }
 0x161   : > { %v862_v11 = vmax.bf16 %v2493_v10, %v861_v9  ;;  %v1002_v9 = vlaneseq }
 0x163   : > { %2051 = vmatmul.mubr.bf16.vlgmr.msra.gmra.mxu0 %v862_v11  ;;  %v1003_v11 = vshrl.u32 %v1002_v9, 7  ;;  %v2273_v9 = vld [vmem:[%s2824_s11] sm:$0xff]  }
 0x164   : > { %1456 = vmatpush1.bf16.msra.mxu0 %v2210_v19 }
 0x165   : > { %1457 = vmatprep.subr.bf16.mxu0 %v2215_v23  ;;  %v2754_v12 = vsub.s32 0, %v1003_v11  ;;  %v2756_v13 = vsub.s32 1, %v1003_v11  ;;  %v1283_v11 = vld [vmem:[%s2823_s10] sm:$0x3] }
 0x167   : > { %v1174_v18 = vrot.slane %v1159_v14, %v2754_v12  ;;  %v1178_v19 = vrot.slane %v1159_v14, %v2756_v13  ;;  %v1005_v21 = vrot.slane %v1000_v17, %v2754_v12  ;;  %v1009_v23 = vrot.slane %v1000_v17, %v2756_v13 }
 0x168   : > { %1458 = vmatpush1.bf16.msra.mxu0 %v2213_v24  ;;  %v1292_v17 = vrot.slane %v1283_v11, %v2756_v13 }
 0x169   : > { %1459 = vmatprep.subr.bf16.mxu0 %v2218_v25  ;;  %v1181_v24 = vmul.f32 %v1174_v18, %v1163_v15  ;;  %v1203_v25 = vrot.slane %v1899_v20, %v2754_v12  ;;  %v1182_v28 = vmul.f32 %v1178_v19, %v1163_v15  ;;  %v1288_v15 = vrot.slane %v1283_v11, %v2754_v12 }
 0x16c   : > { %1460 = vmatpush1.bf16.msra.mxu0 %v2216_v26 }
 0x16d   : > { %1461 = vmatprep.subr.bf16.mxu0 %v2221_v27  ;;  %v1197_v27 = vpop.permute.xlu1 %1196 }
 0x170   : > { %1462 = vmatpush1.bf16.msra.mxu0 %v2219_v29 }
 0x171   : > { %1463 = vmatprep.subr.bf16.mxu0 %v2224_v30  ;;  %v1900_v30 = vld [vmem:[%s2819_s6 + $0x2] ss:$8 sm:$0x3] }
 0x174   : > { %1464 = vmatpush1.bf16.msra.mxu0 %v2222_v31  ;;  %v1207_v31 = vrot.slane %v1899_v20, %v2756_v13 }
 0x175   : > { %1465 = vmatprep.subr.bf16.mxu0 %v2227_v32 }
 0x178   : > { %1466 = vmatpush1.bf16.msra.mxu0 %v2225_v33 }
 0x179   : > { %1467 = vmatprep.subr.bf16.mxu0 %v2230_v34  ;;  %v1210_v34 = vmul.f32 %v1203_v25, %v1193_v16 }
 0x17c   : > { %1468 = vmatpush1.bf16.msra.mxu0 %v2228_v35 }
 0x17d   : > { %1469 = vmatprep.subr.bf16.mxu0 %v2233_v36  ;;  %v1232_v36 = vrot.slane %v1900_v30, %v2754_v12  ;;  %v1933_v12 = vld [vmem:[%s2825_s12] ss:$0 sm:$0xff] }
 0x180   : > { %1470 = vmatpush1.bf16.msra.mxu0 %v2231_v37  ;;  %v1236_v37 = vrot.slane %v1900_v30, %v2756_v13 }
 0x181   : > { %1471 = vmatprep.subr.bf16.mxu0 %v2236_v38 }
 0x184   : > { %1472 = vmatpush2.bf16.msra.mxu0 %v2234_v39  ;;  %v1226_v39 = vpop.permute.xlu1 %1225 }
 0x185   : > { %1473 = vmatprep.subr.bf16.mxu0 %v2239_v40  ;;  %v1183_v40 = vmul.f32 %v1174_v18, %v1168_v22 }
 0x188   : > { %1474 = vmatpush2.bf16.msra.mxu0 %v2237_v41 }
 0x189   : > { %1475 = vmatprep.subr.bf16.mxu0 %v2242_v42  ;;  %v1222_v42 = vpop.permute.xlu0 %1221 }
 0x18c   : > { %1476 = vmatpush2.bf16.msra.mxu0 %v2240_v43 }
 0x18d   : > { %1477 = vmatprep.subr.bf16.mxu0 %v2245_v53  ;;  %v1239_v53 = vmul.f32 %v1232_v36, %v1222_v42 }
 0x190   : > { %1478 = vmatpush2.bf16.msra.mxu0 %v2243_v54  ;;  %v1240_v54 = vmul.f32 %v1236_v37, %v1222_v42 }
 0x191   : > { %1479 = vmatprep.subr.bf16.mxu0 %v2248_v55 }
 0x194   : > { %1480 = vmatpush2.bf16.msra.mxu0 %v2246_v56 }
 0x195   : > { %1481 = vmatprep.subr.bf16.mxu0 %v2251_v57 }
 0x198   : > { %1482 = vmatpush2.bf16.msra.mxu0 %v2249_v58  ;;  %v1242_v58 = vmul.f32 %v1236_v37, %v1226_v39 }
 0x199   : > { %1483 = vmatprep.subr.bf16.mxu0 %v2254_v59 }
 0x19c   : > { %1484 = vmatpush2.bf16.msra.mxu0 %v2252_v60 }
 0x19d   : > { %1485 = vmatprep.subr.bf16.mxu0 %v2257_v62 }
 0x1a0   : > { %1486 = vmatpush2.bf16.msra.mxu0 %v2255_v61 }
 0x223   : > { %v968_v44 = vpop.f32.mrf.mxu0 }
 0x224   : > { %v969_v48 = vadd.f32 %v1869_v45, %v968_v44  ;;  %v1211_v44 = vmul.f32 %v1207_v31, %v1193_v16 }
 0x225   : > { %v2052_v46 = vpop.f32.mrf.mxu0 }
 0x227   : > { %v971_v47 = vpop.f32.mrf.mxu0 }
 0x228   : > { %v972_v49 = vadd.f32 %v1869_v45, %v971_v47  ;;  %v1184_v45 = vmul.f32 %v1178_v19, %v1168_v22  ;;  %v1212_v47 = vmul.f32 %v1203_v25, %v1197_v27 }
 0x229   : > { %v2053_v50 = vpop.f32.mrf.mxu0 }
 0x22a   : > { %v975_v51 = vpack.c.bf16 %v972_v49, %v969_v48  ;;  %v1241_v50 = vmul.f32 %v1232_v36, %v1226_v39 }
 0x22c   : > { %v976_v52 = vmax.bf16 %v2493_v10, %v975_v51  ;;  %v1213_v51 = vmul.f32 %v1207_v31, %v1197_v27 }
 0x22e   : > { %1149 = vmatmul.mubr.bf16.vlgmr.msra.gmra.mxu1 %v976_v52 }
 0x22f   : > { %1993 = vmatpush3.bf16.msra.mxu1 %v2259_v0 }
 0x230   : > { %1994 = vmatprep.subr.bf16.mxu1 %v2260_v1 }
 0x233   : > { %1995 = vmatpush3.bf16.msra.mxu1 %v2261_v2 }
 0x234   : > { %1996 = vmatprep.subr.bf16.mxu1 %v2262_v3 }
 0x237   : > { %1997 = vmatpush3.bf16.msra.mxu1 %v2263_v4  ;;  %v2268_v4 = vld [vmem:[%s2824_s11 + $0x50] sm:$0xff]  }
 0x238   : > { %1998 = vmatprep.subr.bf16.mxu1 %v2264_v5  ;;  %v2269_v5 = vld [vmem:[%s2824_s11 + $0x10] sm:$0xff]  }
 0x23b   : > { %1999 = vmatpush3.bf16.msra.mxu1 %v2265_v6  ;;  %v2270_v6 = vld [vmem:[%s2824_s11 + $0x48] sm:$0xff]  }
 0x23c   : > { %2000 = vmatprep.subr.bf16.mxu1 %v2266_v7  ;;  %v2271_v7 = vld [vmem:[%s2824_s11 + $0x8] sm:$0xff]  }
 0x23f   : > { %2001 = vmatpush3.bf16.msra.mxu1 %v2267_v8  ;;  %v2272_v8 = vld [vmem:[%s2824_s11 + $0x40] sm:$0xff]  }
 0x240   : > { %2002 = vmatprep.subr.bf16.mxu1 %v2268_v4 }
 0x243   : > { %2003 = vmatpush3.bf16.msra.mxu1 %v2269_v5 }
 0x244   : > { %2004 = vmatprep.subr.bf16.mxu1 %v2270_v6 }
 0x247   : > { %2005 = vmatpush3.bf16.msra.mxu1 %v2271_v7 }
 0x248   : > { %2006 = vmatprep.subr.bf16.mxu1 %v2272_v8 }
 0x24b   : > { %2007 = vmatpush3.bf16.msra.mxu1 %v2273_v9 }
 0x2ee   : > { %v1150_v26 = vpop.f32.mrf.mxu1 }
 0x2ef   : > { %v1151_v29 = vadd.f32 %v1150_v26, %v1005_v21 }
 0x2f0   : > { %v1152_v32 = vpop.f32.mrf.mxu1 }
 0x2f1   : > { %v1153_v33 = vadd.f32 %v1152_v32, %v1009_v23  ;;  %v1185_v35 = vadd.f32 %v1181_v24, %v1151_v29 }
 0x2f2   : > { %v1154_v38 = vpop.f32.mrf.mxu1 }
 0x2f3   : > { %v1186_v41 = vadd.f32 %v1182_v28, %v1153_v33  ;;  %v1155_v43 = vadd.f32 %v1154_v38, %v1005_v21  ;;  %v1214_v52 = vadd.f32 %v1210_v34, %v1185_v35 }
 0x2f4   : > { %v1156_v46 = vpop.f32.mrf.mxu1 }
 0x2f5   : > { %v1187_v48 = vadd.f32 %v1183_v40, %v1155_v43  ;;  %v1157_v49 = vadd.f32 %v1156_v46, %v1009_v23  ;;  %v1215_v55 = vadd.f32 %v1211_v44, %v1186_v41  ;;  %v1243_v61 = vadd.f32 %v1239_v53, %v1214_v52 }
 0x2f7   : > { %v1188_v56 = vadd.f32 %v1184_v45, %v1157_v49  ;;  %v1216_v57 = vadd.f32 %v1212_v47, %v1187_v48  ;;  %v1244_v62 = vadd.f32 %v1240_v54, %v1215_v55 }
 0x2f9   : > { %v1217_v59 = vadd.f32 %v1213_v51, %v1188_v56  ;;  %v1245_v60 = vadd.f32 %v1241_v50, %v1216_v57 }
 0x2fb   : > { %v1246_v63 = vadd.f32 %v1242_v58, %v1217_v59  ;;  %v1247_v0 = vpack.c.bf16 %v1245_v60, %v1243_v61 }
 0x2fd   : > { %v1248_v1 = vpack.c.bf16 %v1246_v63, %v1244_v62  ;;  %v1249_v3 = vmax.bf16 %v2493_v10, %v1247_v0 }
 0x2ff   : > { %v1250_v2 = vmax.bf16 %v2493_v10, %v1248_v1 }
 0x301   : > { %1487 = vmatprep.mubr.bf16.mxu0 %v1250_v2 }
 0x302   : > { %1488 = vmatmul.mubr.bf16.vlgmr.msra.gmra.mxu0 %v1249_v3 }
 0x3c2   : > { %v1489_v14 = vpop.f32.mrf.mxu0 }
 0x3c3   : > { %v1490_v20 = vadd.f32 %v1489_v14, %v1288_v15 }
 0x3c4   : > { %v1491_v16 = vpop.f32.mrf.mxu0 }
 0x3c5   : > { %v1492_v22 = vadd.f32 %v1491_v16, %v1292_v17 }
 0x3c6   : > { %v1493_v18 = vpop.f32.mrf.mxu0 }
 0x3c7   : > { %v1494_v19 = vadd.f32 %v1493_v18, %v1288_v15 }
 0x3c8   : > { %v1495_v21 = vpop.f32.mrf.mxu0 }
 0x3c9   : > { %v1496_v23 = vadd.f32 %v1495_v21, %v1292_v17  ;;  %v1498_v24 = vpack.c.bf16 %v1494_v19, %v1490_v20 }
 0x3cb   : > { %v1499_v25 = vpack.c.bf16 %v1496_v23, %v1492_v22  ;;  %v1500_v27 = vmax.bf16 %v2493_v10, %v1498_v24 }
 0x3cd   : > { %v1501_v26 = vmax.bf16 %v2493_v10, %v1499_v25 }
 0x3cf   : > { %1669 = vmatprep.mubr.bf16.mxu1 %v1501_v26 }
 0x3d0   : > { %1670 = vmatmul.mubr.bf16.vlgmr.msra.gmra.mxu1 %v1500_v27 }
 0x490   : > { %v2008_v28 = vpop.f32.mrf.mxu1 }
 0x492   : > { %v2009_v13 = vpop.f32.mrf.mxu1 }
 0x493   : > { %v2010_v29 = vadd.f32 %v2009_v13, %v2008_v28 }
 0x494   : > { %v2011_v30 = vpop.f32.mrf.mxu1 }
 0x495   : > { %v1672_v31 = vadd.f32 %v2010_v29, %v1933_v12 }
 0x496   : > { %v2012_v32 = vpop.f32.mrf.mxu1 }
 0x497   : > { %1679 = vst.msk [vmem:[%s563_s26] sm:$0xff] %vm1678_vm3, %v1672_v31  ;;  %v2013_v10 = vadd.f32 %v2012_v32, %v2011_v30 }
 0x499   : > { %v1675_v33 = vadd.f32 %v2013_v10, %v1933_v12 }
 0x49b   : > { %1680 = vst.msk [vmem:[%s563_s26 + $0x8] sm:$0xff] %vm1678_vm3, %v1675_v33 }
 0x49c PF: > { %s27_s25 = sadd.s32 1, %s2478_s25  }
 0x49d   : > { %p24_p6 = scmp.ge.s32.totalorder %s27_s25, 4  }
 0x49f   :  { %26 = sbr.rel (!%p24_p6) target bundleno = 4 (0x4), region = 136 }
 0x4a4   :  { %1703 = vsyncpa [#allocation3], 1 }
 0x4a5   :  { %1705 = vsyncpa [#allocation3 + $0x1], 1 }
 0x4a6   :  { %1706 = vsyncpa [#allocation5], 1 }
 0x4a7   :  { %1707 = vsyncpa [#allocation8], 1 }
 0x4a8   :  { %1708 = vsyncpa [#allocation11], 1 }

</bundles_post_ra>
